<compile_context>
chip_gen: v5e
topology: v5e:2x2
jax: 0.10.0
libtpu: 0.0.40
codegen_flags: <defaults>
</compile_context>

<pallas_src>
import jax
import jax.numpy as jnp
from jax.experimental import pallas as pl
from jax.experimental.pallas import tpu as pltpu

# ---------------- module hyper-parameters (match PyTorch defaults) ----------------
NUM_CONSTRAINTS = 1
KNAPSACK_CAPACITY = 1.0
WEIGHT_MIN = 0.15
WEIGHT_MAX = 0.35
COST_MIN = 0.1
COST_MAX = 0.45
WEIGHT_RANGE = WEIGHT_MAX - WEIGHT_MIN
COST_RANGE = COST_MAX - COST_MIN

# small, self-consistent shapes (stand-ins for embed_dim=4096 etc.)
EMBED_DIM = 256          # embed_dim
HIDDEN = 128             # hidden_layer_size
BATCH = 2
NUM_VARIABLES = 8
OUT_FEATURES = NUM_CONSTRAINTS + 1   # = 2

MAX_TM = 512             # row tile cap at real scale
MAX_TK = 1024            # K (embed) tile cap at real scale


def _mlp_extract_kernel(x_ref, w1_ref, b1_ref, w2_ref, b2_ref, scale_ref, off_ref,
                        y_ref, acc_ref):
    """y = offset + scale * sigmoid(relu(x @ W1 + b1) @ W2pad + b2pad)

    K-tiled over the embed dim: acc accumulates x @ W1 across the K grid axis,
    the fc1 bias is folded into the accumulator init, and ReLU / fc2 / sigmoid /
    affine run only on the final K step.  Output block is lane-dense (128 wide).
    """
    k = pl.program_id(1)

    @pl.when(k == 0)
    def _():
        # fold fc1 bias into the accumulator init (one fewer vector add per K step)
        acc_ref[...] = jnp.broadcast_to(b1_ref[...], acc_ref.shape)

    acc_ref[...] += jnp.dot(x_ref[...], w1_ref[...],
                            preferred_element_type=jnp.float32)

    @pl.when(k == pl.num_programs(1) - 1)
    def _():
        h = jnp.maximum(acc_ref[...], 0.0)                               # ReLU
        z = jnp.dot(h, w2_ref[...],
                    preferred_element_type=jnp.float32) + b2_ref[...]
        s = jax.nn.sigmoid(z)                                            # EUP exp + recip
        # per-column affine: col 0 -> -(cost_min + cost_range*s),
        #                    col 1.. ->  weight_min + weight_range*s
        y_ref[...] = off_ref[...] + scale_ref[...] * s


def _pick_k_tile(E):
    tk = min(E, MAX_TK)
    while E % tk:
        tk //= 2
    return max(tk, 1)


def _mlp_extract(x2d, w1, b1, w2p, b2p, scale, offset):
    M, E = x2d.shape
    H = w1.shape[1]
    OUTP = w2p.shape[1]            # lane-padded output width (multiple of 128)

    tm = M if M <= MAX_TM else MAX_TM            # whole problem in one step at toy size
    tk = _pick_k_tile(E)

    grid = (pl.cdiv(M, tm), E // tk)             # reduction axis last

    return pl.pallas_call(
        _mlp_extract_kernel,
        out_shape=jax.ShapeDtypeStruct((M, OUTP), jnp.float32),
        grid_spec=pltpu.PrefetchScalarGridSpec(
            num_scalar_prefetch=0,
            grid=grid,
            in_specs=[
                pl.BlockSpec((tm, tk), lambda i, k: (i, k)),     # x rows x K-slab
                pl.BlockSpec((tk, H), lambda i, k: (k, 0)),      # W1 K-slab
                pl.BlockSpec((1, H), lambda i, k: (0, 0)),       # b1
                pl.BlockSpec((H, OUTP), lambda i, k: (0, 0)),    # W2 (lane padded)
                pl.BlockSpec((1, OUTP), lambda i, k: (0, 0)),    # b2 (lane padded)
                pl.BlockSpec((1, OUTP), lambda i, k: (0, 0)),    # per-col scale
                pl.BlockSpec((1, OUTP), lambda i, k: (0, 0)),    # per-col offset
            ],
            out_specs=pl.BlockSpec((tm, OUTP), lambda i, k: (i, 0)),
            scratch_shapes=[pltpu.VMEM((tm, H), jnp.float32)],   # fc1 accumulator
        ),
        compiler_params=pltpu.CompilerParams(
            dimension_semantics=("parallel", "arbitrary"),
            vmem_limit_bytes=48 * 1024 * 1024,                   # fits v7x's 64 MiB VMEM
        ),
    )(x2d, w1, b1, w2p, b2p, scale, offset)


def knapsack_forward(x, w1, b1, w2, b2):
    """x: (B, V, E) float32.  Returns (cost (B, V), constraints (B, C, V+1))."""
    B, V, E = x.shape
    H = w1.shape[1]
    C1 = w2.shape[1]                               # num_constraints + 1
    out_pad = max(128, ((C1 + 127) // 128) * 128)  # lane-dense output width

    # zero-pad fc2 to a lane-dense output; padded columns are sliced off below
    w2p = jnp.zeros((H, out_pad), jnp.float32).at[:, :C1].set(w2.astype(jnp.float32))
    b2p = jnp.zeros((1, out_pad), jnp.float32).at[0, :C1].set(b2.astype(jnp.float32))

    # precomputed per-column affine (replaces iota + where inside the kernel)
    scale = jnp.full((1, out_pad), WEIGHT_RANGE, jnp.float32).at[0, 0].set(-COST_RANGE)
    offset = jnp.full((1, out_pad), WEIGHT_MIN, jnp.float32).at[0, 0].set(-COST_MIN)

    # flatten rows and zero-pad to a sublane multiple (8) for the (8,128) rule
    M = B * V
    Mp = ((M + 7) // 8) * 8
    x2d = x.reshape(M, E).astype(jnp.float32)
    if Mp != M:
        x2d = jnp.zeros((Mp, E), jnp.float32).at[:M].set(x2d)

    y = _mlp_extract(
        x2d,
        w1.astype(jnp.float32), b1.reshape(1, -1).astype(jnp.float32),
        w2p, b2p, scale, offset,
    )
    y = y[:M, :C1].reshape(B, V, C1)

    cost = y[..., 0]                                   # already -(cost_min + range*sig)
    As = jnp.transpose(y[..., 1:], (0, 2, 1))          # (B, C, V), already scaled
    neg_cap = -jnp.ones((B, C1 - 1, 1), jnp.float32) * KNAPSACK_CAPACITY
    constraints = jnp.concatenate([As, neg_cap], axis=-1)   # (B, C, V+1)
    return cost, constraints


def _reference_forward(x, w1, b1, w2, b2):
    """Pure-JAX reference mirroring the PyTorch module."""
    h = jnp.maximum(x.astype(jnp.float32) @ w1 + b1, 0.0)
    y = jax.nn.sigmoid(h @ w2 + b2)                    # (B, V, C+1)
    cost = -(COST_MIN + COST_RANGE * y[..., 0])
    As = WEIGHT_MIN + WEIGHT_RANGE * jnp.transpose(y[..., 1:], (0, 2, 1))
    neg_cap = -jnp.ones((x.shape[0], NUM_CONSTRAINTS, 1), jnp.float32) * KNAPSACK_CAPACITY
    return cost, jnp.concatenate([As, neg_cap], axis=-1)


if __name__ == "__main__":
    key = jax.random.PRNGKey(0)
    kx, k1, k2, k3, k4 = jax.random.split(key, 5)

    # deterministic synthetic parameters (PyTorch-Linear-like uniform init)
    lim1 = 1.0 / (EMBED_DIM ** 0.5)
    lim2 = 1.0 / (HIDDEN ** 0.5)
    w1 = jax.random.uniform(k1, (EMBED_DIM, HIDDEN), jnp.float32, -lim1, lim1)
    b1 = jax.random.uniform(k2, (HIDDEN,), jnp.float32, -lim1, lim1)
    w2 = jax.random.uniform(k3, (HIDDEN, OUT_FEATURES), jnp.float32, -lim2, lim2)
    b2 = jax.random.uniform(k4, (OUT_FEATURES,), jnp.float32, -lim2, lim2)

    x = jax.random.normal(kx, (BATCH, NUM_VARIABLES, EMBED_DIM), jnp.float32)

    cost, constraints = knapsack_forward(x, w1, b1, w2, b2)
    jax.block_until_ready((cost, constraints))

    # sanity check against pure-JAX reference
    ref_cost, ref_constraints = _reference_forward(x, w1, b1, w2, b2)
    assert cost.shape == (BATCH, NUM_VARIABLES)
    assert constraints.shape == (BATCH, NUM_CONSTRAINTS, NUM_VARIABLES + 1)
    assert jnp.allclose(cost, ref_cost, atol=1e-5, rtol=1e-5)
    assert jnp.allclose(constraints, ref_constraints, atol=1e-5, rtol=1e-5)

    print("KERNEL_OK")
</pallas_src>

<mosaic_0001>
module attributes {stable_mosaic.version = 11 : i64} {
  func.func @_mlp_extract_kernel(%arg0: i32, %arg1: i32, %arg2: memref<16x256xf32, #tpu.memory_space<vmem>>, %arg3: memref<256x128xf32, #tpu.memory_space<vmem>>, %arg4: memref<1x128xf32, #tpu.memory_space<vmem>>, %arg5: memref<128x128xf32, #tpu.memory_space<vmem>>, %arg6: memref<1x128xf32, #tpu.memory_space<vmem>>, %arg7: memref<1x128xf32, #tpu.memory_space<vmem>>, %arg8: memref<1x128xf32, #tpu.memory_space<vmem>>, %arg9: memref<16x128xf32, #tpu.memory_space<vmem>>, %arg10: memref<16x128xf32, #tpu.memory_space<vmem>>) attributes {dimension_semantics = [#tpu.dimension_semantics<parallel>, #tpu.dimension_semantics<arbitrary>], iteration_bounds = array<i64: 1, 1>, scalar_prefetch = 0 : i64, scratch_operands = 1 : i64, tpu.core_type = #tpu.core_type<tc>, window_params = [{transform_indices = @transform_0, window_bounds = array<i64: 16, 256>}, {transform_indices = @transform_1, window_bounds = array<i64: 256, 128>}, {pipeline_mode = #tpu.pipeline_mode<synchronous>, transform_indices = @transform_2, window_bounds = array<i64: 1, 128>}, {pipeline_mode = #tpu.pipeline_mode<synchronous>, transform_indices = @transform_3, window_bounds = array<i64: 128, 128>}, {pipeline_mode = #tpu.pipeline_mode<synchronous>, transform_indices = @transform_4, window_bounds = array<i64: 1, 128>}, {pipeline_mode = #tpu.pipeline_mode<synchronous>, transform_indices = @transform_5, window_bounds = array<i64: 1, 128>}, {pipeline_mode = #tpu.pipeline_mode<synchronous>, transform_indices = @transform_6, window_bounds = array<i64: 1, 128>}, {transform_indices = @transform_7, window_bounds = array<i64: 16, 128>}]} {
    %c0_i32 = arith.constant 0 : i32
    %0 = arith.cmpi eq, %arg1, %c0_i32 : i32
    %1 = arith.extui %0 : i1 to i32
    %c0_i32_0 = arith.constant 0 : i32
    %2 = arith.cmpi ne, %1, %c0_i32_0 : i32
    scf.if %2 {
      %c0_10 = arith.constant 0 : index
      %c0_11 = arith.constant 0 : index
      %12 = vector.load %arg4[%c0_10, %c0_11] : memref<1x128xf32, #tpu.memory_space<vmem>>, vector<1x128xf32>
      %13 = vector.shape_cast %12 : vector<1x128xf32> to vector<1x128xf32>
      %14 = vector.broadcast %13 : vector<1x128xf32> to vector<16x128xf32>
      %c0_12 = arith.constant 0 : index
      %c0_13 = arith.constant 0 : index
      %15 = vector.load %arg10[%c0_12, %c0_13] : memref<16x128xf32, #tpu.memory_space<vmem>>, vector<16x128xf32>
      tpu.vector_store %arg10[%c0_12, %c0_13], %14 {strides = array<i32>} : memref<16x128xf32, #tpu.memory_space<vmem>>, vector<16x128xf32>,
    } else {
    }
    %c0 = arith.constant 0 : index
    %c0_1 = arith.constant 0 : index
    %3 = vector.load %arg10[%c0, %c0_1] : memref<16x128xf32, #tpu.memory_space<vmem>>, vector<16x128xf32>
    %c0_2 = arith.constant 0 : index
    %c0_3 = arith.constant 0 : index
    %4 = vector.load %arg2[%c0_2, %c0_3] : memref<16x256xf32, #tpu.memory_space<vmem>>, vector<16x256xf32>
    %c0_4 = arith.constant 0 : index
    %c0_5 = arith.constant 0 : index
    %5 = vector.load %arg3[%c0_4, %c0_5] : memref<256x128xf32, #tpu.memory_space<vmem>>, vector<256x128xf32>
    %cst = arith.constant dense<0.000000e+00> : vector<16x128xf32>
    %6 = tpu.matmul %4, %5, %cst {dimension_numbers = #tpu.dot_dimension_numbers<[1], [0], [0], [1], [0, 0, 1, 1], [], []>} : vector<16x256xf32>, vector<256x128xf32>, vector<16x128xf32> -> vector<16x128xf32>
    %7 = arith.addf %3, %6 : vector<16x128xf32>
    %c0_6 = arith.constant 0 : index
    %c0_7 = arith.constant 0 : index
    %8 = vector.load %arg10[%c0_6, %c0_7] : memref<16x128xf32, #tpu.memory_space<vmem>>, vector<16x128xf32>
    tpu.vector_store %arg10[%c0_6, %c0_7], %7 {strides = array<i32>} : memref<16x128xf32, #tpu.memory_space<vmem>>, vector<16x128xf32>,
    %c0_i32_8 = arith.constant 0 : i32
    %9 = arith.cmpi eq, %arg1, %c0_i32_8 : i32
    %10 = arith.extui %9 : i1 to i32
    %c0_i32_9 = arith.constant 0 : i32
    %11 = arith.cmpi ne, %10, %c0_i32_9 : i32
    scf.if %11 {
      %c0_10 = arith.constant 0 : index
      %c0_11 = arith.constant 0 : index
      %12 = vector.load %arg10[%c0_10, %c0_11] : memref<16x128xf32, #tpu.memory_space<vmem>>, vector<16x128xf32>
      %cst_12 = arith.constant 0.000000e+00 : f32
      %13 = vector.broadcast %cst_12 : f32 to vector<16x128xf32>
      %14 = arith.maximumf %12, %13 : vector<16x128xf32>
      %c0_13 = arith.constant 0 : index
      %c0_14 = arith.constant 0 : index
      %15 = vector.load %arg5[%c0_13, %c0_14] : memref<128x128xf32, #tpu.memory_space<vmem>>, vector<128x128xf32>
      %cst_15 = arith.constant dense<0.000000e+00> : vector<16x128xf32>
      %16 = tpu.matmul %14, %15, %cst_15 {dimension_numbers = #tpu.dot_dimension_numbers<[1], [0], [0], [1], [0, 0, 1, 1], [], []>} : vector<16x128xf32>, vector<128x128xf32>, vector<16x128xf32> -> vector<16x128xf32>
      %c0_16 = arith.constant 0 : index
      %c0_17 = arith.constant 0 : index
      %17 = vector.load %arg6[%c0_16, %c0_17] : memref<1x128xf32, #tpu.memory_space<vmem>>, vector<1x128xf32>
      %18 = vector.broadcast %17 : vector<1x128xf32> to vector<16x128xf32>
      %19 = arith.addf %16, %18 : vector<16x128xf32>
      %20 = arith.negf %19 : vector<16x128xf32>
      %21 = math.exp %20 : vector<16x128xf32>
      %cst_18 = arith.constant 1.000000e+00 : f32
      %22 = vector.broadcast %cst_18 : f32 to vector<16x128xf32>
      %23 = arith.addf %22, %21 : vector<16x128xf32>
      %24 = arith.divf %22, %23 : vector<16x128xf32>
      %c0_19 = arith.constant 0 : index
      %c0_20 = arith.constant 0 : index
      %25 = vector.load %arg8[%c0_19, %c0_20] : memref<1x128xf32, #tpu.memory_space<vmem>>, vector<1x128xf32>
      %c0_21 = arith.constant 0 : index
      %c0_22 = arith.constant 0 : index
      %26 = vector.load %arg7[%c0_21, %c0_22] : memref<1x128xf32, #tpu.memory_space<vmem>>, vector<1x128xf32>
      %27 = vector.broadcast %26 : vector<1x128xf32> to vector<16x128xf32>
      %28 = arith.mulf %27, %24 : vector<16x128xf32>
      %29 = vector.broadcast %25 : vector<1x128xf32> to vector<16x128xf32>
      %30 = arith.addf %29, %28 : vector<16x128xf32>
      %c0_23 = arith.constant 0 : index
      %c0_24 = arith.constant 0 : index
      %31 = vector.load %arg9[%c0_23, %c0_24] : memref<16x128xf32, #tpu.memory_space<vmem>>, vector<16x128xf32>
      tpu.vector_store %arg9[%c0_23, %c0_24], %30 {strides = array<i32>} : memref<16x128xf32, #tpu.memory_space<vmem>>, vector<16x128xf32>,
    } else {
    }
    return
  }
  func.func @transform_0(%arg0: i32, %arg1: i32) -> (i32, i32) {
    %c0_i32 = arith.constant 0 : i32
    return %arg0, %arg1 : i32, i32
  }
  func.func @transform_1(%arg0: i32, %arg1: i32) -> (i32, i32) {
    %c0_i32 = arith.constant 0 : i32
    %c0_i32_0 = arith.constant 0 : i32
    return %arg1, %c0_i32 : i32, i32
  }
  func.func @transform_2(%arg0: i32, %arg1: i32) -> (i32, i32) {
    %c0_i32 = arith.constant 0 : i32
    %c0_i32_0 = arith.constant 0 : i32
    %c0_i32_1 = arith.constant 0 : i32
    return %c0_i32, %c0_i32_0 : i32, i32
  }
  func.func @transform_3(%arg0: i32, %arg1: i32) -> (i32, i32) {
    %c0_i32 = arith.constant 0 : i32
    %c0_i32_0 = arith.constant 0 : i32
    %c0_i32_1 = arith.constant 0 : i32
    return %c0_i32, %c0_i32_0 : i32, i32
  }
  func.func @transform_4(%arg0: i32, %arg1: i32) -> (i32, i32) {
    %c0_i32 = arith.constant 0 : i32
    %c0_i32_0 = arith.constant 0 : i32
    %c0_i32_1 = arith.constant 0 : i32
    return %c0_i32, %c0_i32_0 : i32, i32
  }
  func.func @transform_5(%arg0: i32, %arg1: i32) -> (i32, i32) {
    %c0_i32 = arith.constant 0 : i32
    %c0_i32_0 = arith.constant 0 : i32
    %c0_i32_1 = arith.constant 0 : i32
    return %c0_i32, %c0_i32_0 : i32, i32
  }
  func.func @transform_6(%arg0: i32, %arg1: i32) -> (i32, i32) {
    %c0_i32 = arith.constant 0 : i32
    %c0_i32_0 = arith.constant 0 : i32
    %c0_i32_1 = arith.constant 0 : i32
    return %c0_i32, %c0_i32_0 : i32, i32
  }
  func.func @transform_7(%arg0: i32, %arg1: i32) -> (i32, i32) {
    %c0_i32 = arith.constant 0 : i32
    %c0_i32_0 = arith.constant 0 : i32
    return %arg0, %c0_i32 : i32, i32
  }
}

</mosaic_0001>

<bundles_post_ra>
// kernel: tpu_custom_call.1
= control target key start
LH: loop header
LB: loop body
LE: loop exit
PB: predicated region body
PF: predicated region fallthrough
CT: control target
= control target key end

     0   :  { %12 = vsyncpa [#allocation4], 0  ;;  %s515_s0 = inlined_call_operand.hbm [shape: f32[16,256], index: 0, kind: input, shape index: {}]   ;;  %s516_s1 = inlined_call_operand.hbm [shape: f32[256,128], index: 1, kind: input, shape index: {}]   ;;  %s517_s2 = inlined_call_operand.vmem [shape: f32[1,128], index: 2, kind: input, shape index: {}]   ;;  %s518_s3 = inlined_call_operand.hbm [shape: f32[128,128], index: 3, kind: input, shape index: {}]   ;;  %s519_s4 = inlined_call_operand.vmem [shape: f32[1,128], index: 4, kind: input, shape index: {}]   ;;  %s520_s5 = inlined_call_operand.vmem [shape: f32[1,128], index: 5, kind: input, shape index: {}]   ;;  %s521_s6 = inlined_call_operand.vmem [shape: f32[1,128], index: 6, kind: input, shape index: {}]   ;;  %s522_s7 = inlined_call_operand.hbm [shape: f32[16,128], index: 7, kind: output, shape index: {}]  }
   0x1   :  { %13 = vsyncpa [#allocation7], 0  ;;  %s32_s26 = sshll.u32 %s516_s1, 4  ;;  %s33_s26 = int_to_ptr.hbm [resolvable:$true] %s32_s26 }
   0x2   :  { %14 = vsyncpa [#allocation5], 0  ;;  %s434_s27 = smov [#allocation6]   ;;  %s19_s8 = sshll.u32 %s515_s0, 4  ;;  %s20_s8 = int_to_ptr.hbm [resolvable:$true] %s19_s8 }
   0x3   :  { %s34_s28 = sshll.u32 %s434_s27, 4  ;;  %s435_s9 = smov 128   ;;  %s35_s28 = int_to_ptr.vmem [resolvable:$true] %s34_s28 }
   0x4   :  { %s436_s10 = smov 8   ;;  %s437_s11 = smov [#allocation3]  }
   0x5   :  { %40 = dma.hbm_to_vmem [thread:$0]  %s33_s26, 4096, %s35_s28, [#allocation7], %s435_s9, %s435_s9, %s436_s10  }
   0x6   :  { %s21_s12 = sshll.u32 %s437_s11, 4  ;;  %s438_s1 = smov 256   ;;  %s22_s12 = int_to_ptr.vmem [resolvable:$true] %s21_s12 }
   0x7   :  { %s439_s13 = smov 16   ;;  %s47_s16 = sshll.u32 %s518_s3, 4  ;;  %s48_s16 = int_to_ptr.hbm [resolvable:$true] %s47_s16 }
   0x8   :  { %27 = dma.hbm_to_vmem [thread:$0]  %s20_s8, 512, %s22_s12, [#allocation4], %s438_s1, %s438_s1, %s439_s13  }
   0x9   :  { %s440_s17 = smov [#allocation8]  }
   0xa   :  { %s49_s0 = sshll.u32 %s440_s17, 4  ;;  %s50_s0 = int_to_ptr.vmem [resolvable:$true] %s49_s0 }
   0xb   :  { %55 = dma.hbm_to_vmem [thread:$0]  %s48_s16, 2048, %s50_s0, [#allocation7], %s435_s9, %s435_s9, %s436_s10  }
   0xc   :  { %428 = dma.done.wait [#allocation4], 512  }
   0xd   :  { %429 = vsyncadd [#allocation4], 4294966784 }
   0xe   :  { %430 = dma.done.wait [#allocation7], 6144  }
   0xf   :  { %431 = vsyncadd [#allocation7], 4294961152  ;;  %v105_v0 = vld [vmem:[#allocation6 + $0x78] sm:$0xff]  ;;  %v104_v2 = vld [vmem:[#allocation6 + $0x70] sm:$0xff]  ;;  %s280_s25 = sshll.u32 %s522_s7, 4  ;;  %s281_s25 = int_to_ptr.hbm [resolvable:$true] %s280_s25 }
  0x10   :  { %v121_v1 = vld [vmem:[#allocation6 + $0xf8] sm:$0xff]  ;;  %122 = vmatpush.msra.mxu0 %v105_v0  ;;  %v120_v3 = vld [vmem:[#allocation6 + $0xf0] sm:$0xff]  ;;  %296 = vmatpush.msra.mxu3 %v105_v0  ;;  %v103_v4 = vld [vmem:[#allocation6 + $0x68] sm:$0xff] }
  0x11   :  { %145 = vmatpush.msra.mxu1 %v121_v1  ;;  %v119_v5 = vld [vmem:[#allocation6 + $0xe8] sm:$0xff]  ;;  %v102_v6 = vld [vmem:[#allocation6 + $0x60] sm:$0xff]  ;;  %v101_v8 = vld [vmem:[#allocation6 + $0x58] sm:$0xff] }
  0x12   :  { %123 = vmatpush.msra.mxu0 %v104_v2  ;;  %297 = vmatpush.msra.mxu3 %v104_v2  ;;  %v118_v7 = vld [vmem:[#allocation6 + $0xe0] sm:$0xff]  ;;  %v117_v9 = vld [vmem:[#allocation6 + $0xd8] sm:$0xff]  ;;  %v100_v10 = vld [vmem:[#allocation6 + $0x50] sm:$0xff] }
  0x13   :  { %146 = vmatpush.msra.mxu1 %v120_v3  ;;  %v116_v11 = vld [vmem:[#allocation6 + $0xd0] sm:$0xff]  ;;  %v99_v12 = vld [vmem:[#allocation6 + $0x48] sm:$0xff]  ;;  %v98_v14 = vld [vmem:[#allocation6 + $0x40] sm:$0xff] }
  0x14   :  { %124 = vmatpush.msra.mxu0 %v103_v4  ;;  %298 = vmatpush.msra.mxu3 %v103_v4  ;;  %v115_v13 = vld [vmem:[#allocation6 + $0xc8] sm:$0xff]  ;;  %v114_v15 = vld [vmem:[#allocation6 + $0xc0] sm:$0xff]  ;;  %v194_v16 = vld [vmem:[#allocation8 + $0x78] sm:$0xff] }
  0x15   :  { %147 = vmatpush.msra.mxu1 %v119_v5  ;;  %v193_v17 = vld [vmem:[#allocation8 + $0x70] sm:$0xff]  ;;  %v97_v18 = vld [vmem:[#allocation6 + $0x38] sm:$0xff]  ;;  %199 = vmatpush.msra.mxu2 %v194_v16  ;;  %v192_v22 = vld [vmem:[#allocation8 + $0x68] sm:$0xff] }
  0x16   :  { %125 = vmatpush.msra.mxu0 %v102_v6  ;;  %299 = vmatpush.msra.mxu3 %v102_v6  ;;  %v113_v19 = vld [vmem:[#allocation6 + $0xb8] sm:$0xff]  ;;  %v96_v20 = vld [vmem:[#allocation6 + $0x30] sm:$0xff]  ;;  %v191_v23 = vld [vmem:[#allocation8 + $0x60] sm:$0xff] }
  0x17   :  { %148 = vmatpush.msra.mxu1 %v118_v7  ;;  %v112_v21 = vld [vmem:[#allocation6 + $0xb0] sm:$0xff]  ;;  %200 = vmatpush.msra.mxu2 %v193_v17  ;;  %v95_v24 = vld [vmem:[#allocation6 + $0x28] sm:$0xff]  ;;  %v190_v26 = vld [vmem:[#allocation8 + $0x58] sm:$0xff] }
  0x18   :  { %126 = vmatpush.msra.mxu0 %v101_v8  ;;  %300 = vmatpush.msra.mxu3 %v101_v8  ;;  %v111_v25 = vld [vmem:[#allocation6 + $0xa8] sm:$0xff]  ;;  %v94_v27 = vld [vmem:[#allocation6 + $0x20] sm:$0xff]  ;;  %v189_v29 = vld [vmem:[#allocation8 + $0x50] sm:$0xff] }
  0x19   :  { %149 = vmatpush.msra.mxu1 %v117_v9  ;;  %201 = vmatpush.msra.mxu2 %v192_v22  ;;  %v110_v28 = vld [vmem:[#allocation6 + $0xa0] sm:$0xff]  ;;  %v93_v30 = vld [vmem:[#allocation6 + $0x18] sm:$0xff]  ;;  %v188_v32 = vld [vmem:[#allocation8 + $0x48] sm:$0xff] }
  0x1a   :  { %127 = vmatpush.msra.mxu0 %v100_v10  ;;  %301 = vmatpush.msra.mxu3 %v100_v10  ;;  %v109_v31 = vld [vmem:[#allocation6 + $0x98] sm:$0xff]  ;;  %v92_v33 = vld [vmem:[#allocation6 + $0x10] sm:$0xff]  ;;  %v187_v35 = vld [vmem:[#allocation8 + $0x40] sm:$0xff] }
  0x1b   :  { %150 = vmatpush.msra.mxu1 %v116_v11  ;;  %202 = vmatpush.msra.mxu2 %v191_v23  ;;  %v108_v34 = vld [vmem:[#allocation6 + $0x90] sm:$0xff]  ;;  %v91_v36 = vld [vmem:[#allocation6 + $0x8] sm:$0xff]  ;;  %v186_v38 = vld [vmem:[#allocation8 + $0x38] sm:$0xff] }
  0x1c   :  { %128 = vmatpush.msra.mxu0 %v99_v12  ;;  %302 = vmatpush.msra.mxu3 %v99_v12  ;;  %v107_v37 = vld [vmem:[#allocation6 + $0x88] sm:$0xff]  ;;  %v90_v39 = vld [vmem:[#allocation6] sm:$0xff]  ;;  %v185_v43 = vld [vmem:[#allocation8 + $0x30] sm:$0xff] }
  0x1d   :  { %151 = vmatpush.msra.mxu1 %v115_v13  ;;  %203 = vmatpush.msra.mxu2 %v190_v26  ;;  %v106_v40 = vld [vmem:[#allocation6 + $0x80] sm:$0xff]  ;;  %v87_v42 = vld [vmem:[#allocation3 + $0x8] sm:$0xff]  ;;  %v88_v44 = vld [vmem:[#allocation3 + $0x10] sm:$0xff] }
  0x1e   :  { %129 = vmatpush.msra.mxu0 %v98_v14  ;;  %303 = vmatpush.msra.mxu3 %v98_v14  ;;  %v86_v41 = vld [vmem:[#allocation3] sm:$0xff]  ;;  %v184_v45 = vld [vmem:[#allocation8 + $0x28] sm:$0xff]  ;;  %v89_v47 = vld [vmem:[#allocation3 + $0x18] sm:$0xff] }
  0x1f   :  { %152 = vmatpush.msra.mxu1 %v114_v15  ;;  %204 = vmatpush.msra.mxu2 %v189_v29  ;;  %v183_v46 = vld [vmem:[#allocation8 + $0x20] sm:$0xff]  ;;  %v182_v48 = vld [vmem:[#allocation8 + $0x18] sm:$0xff]  ;;  %v181_v49 = vld [vmem:[#allocation8 + $0x10] sm:$0xff] }
  0x20   :  { %130 = vmatpush.msra.mxu0 %v97_v18  ;;  %304 = vmatpush.msra.mxu3 %v97_v18  ;;  %v180_v50 = vld [vmem:[#allocation8 + $0x8] sm:$0xff]  ;;  %v179_v51 = vld [vmem:[#allocation8] sm:$0xff] }
  0x21   :  { %153 = vmatpush.msra.mxu1 %v113_v19  ;;  %205 = vmatpush.msra.mxu2 %v188_v32  ;;  %v320_v52 = vld [vmem:[%s517_s2] ss:$0 sm:$0xff] }
  0x22   :  { %131 = vmatpush.msra.mxu0 %v96_v20  ;;  %305 = vmatpush.msra.mxu3 %v96_v20  ;;  %v321_v63 = vld [vmem:[%s519_s4] ss:$0 sm:$0xff] }
  0x23   :  { %154 = vmatpush.msra.mxu1 %v112_v21  ;;  %206 = vmatpush.msra.mxu2 %v187_v35  ;;  %v322_v17 = vld [vmem:[%s520_s5] ss:$0 sm:$0xff]  ;;  %s441_s5 = smov [#allocation9]  }
  0x24   :  { %132 = vmatpush.msra.mxu0 %v95_v24  ;;  %306 = vmatpush.msra.mxu3 %v95_v24  ;;  %v323_v22 = vld [vmem:[%s521_s6] ss:$0 sm:$0xff]  ;;  %s278_s23 = sshll.u32 %s441_s5, 4  ;;  %s279_s23 = int_to_ptr.vmem [resolvable:$true] %s278_s23 }
  0x25   :  { %155 = vmatpush.msra.mxu1 %v111_v25  ;;  %207 = vmatpush.msra.mxu2 %v186_v38 }
  0x26   :  { %133 = vmatpush.msra.mxu0 %v94_v27  ;;  %307 = vmatpush.msra.mxu3 %v94_v27 }
  0x27   :  { %156 = vmatpush.msra.mxu1 %v110_v28  ;;  %208 = vmatpush.msra.mxu2 %v185_v43 }
  0x28   :  { %134 = vmatpush.msra.mxu0 %v93_v30  ;;  %308 = vmatpush.msra.mxu3 %v93_v30 }
  0x29   :  { %157 = vmatpush.msra.mxu1 %v109_v31  ;;  %209 = vmatpush.msra.mxu2 %v184_v45 }
  0x2a   :  { %135 = vmatpush.msra.mxu0 %v92_v33  ;;  %309 = vmatpush.msra.mxu3 %v92_v33 }
  0x2b   :  { %158 = vmatpush.msra.mxu1 %v108_v34  ;;  %210 = vmatpush.msra.mxu2 %v183_v46 }
  0x2c   :  { %136 = vmatpush.msra.mxu0 %v91_v36  ;;  %310 = vmatpush.msra.mxu3 %v91_v36 }
  0x2d   :  { %159 = vmatpush.msra.mxu1 %v107_v37  ;;  %211 = vmatpush.msra.mxu2 %v182_v48 }
  0x2e   :  { %137 = vmatpush.msra.mxu0 %v90_v39  ;;  %311 = vmatpush.msra.mxu3 %v90_v39 }
  0x2f   :  { %160 = vmatpush.msra.mxu1 %v106_v40  ;;  %138 = vmatmul.f32.vlgmr.msra.gmra.mxu0 %v86_v41 }
  0x30   :  { %161 = vmatmul.f32.vlgmr.msra.gmra.mxu1 %v87_v42  ;;  %141 = vmatmul.f32.vlgmr.msra.gmra.mxu3 %v88_v44 }
  0x31   :  { %212 = vmatpush.msra.mxu2 %v181_v49 }
  0x33   :  { %213 = vmatpush.msra.mxu2 %v180_v50 }
  0x35   :  { %214 = vmatpush.msra.mxu2 %v179_v51 }
  0x38   :  { %164 = vmatmul.f32.gmra.mxu1 %v89_v47 }
  0xac   :  { %v139_v53 = vpop.f32.mrf.mxu0 }
  0xad   :  { %v162_v54 = vpop.f32.mrf.mxu1 }
  0xae   :  { %v163_v55 = vadd.f32 %v162_v54, %v139_v53 }
  0xb0   :  { %v168_v56 = vadd.f32 %v320_v52, %v163_v55 }
  0xb2   :  { %v177_v57 = vmax.f32 %v168_v56, 0.0 }
  0xb3   :  { %v142_v58 = vpop.f32.mrf.mxu3 }
  0xb4   :  { %215 = vmatmul.f32.vlgmr.msra.gmra.mxu2 %v177_v57 }
  0xb5   :  { %v165_v59 = vpop.f32.mrf.mxu1 }
  0xb6   :  { %v166_v60 = vadd.f32 %v165_v59, %v142_v58 }
  0xb8   :  { %v169_v61 = vadd.f32 %v320_v52, %v166_v60 }
  0xba   :  { %v178_v62 = vmax.f32 %v169_v61, 0.0 }
  0xbc   :  { %218 = vmatmul.f32.gmra.mxu2 %v178_v62 }
 0x137   :  { %v216_v0 = vpop.f32.mrf.mxu2 }
 0x138   :  { %v217_v1 = vadd.f32 %v321_v63, %v216_v0 }
 0x13a   :  { %v294_v2 = vmul.f32 -1.442695, %v217_v1 }
 0x13c   :  { %324 = vpow2.f32 %v294_v2 }
 0x13f   :  { %v219_v3 = vpop.f32.mrf.mxu2 }
 0x140   :  { %v220_v4 = vadd.f32 %v321_v63, %v219_v3 }
 0x142   :  { %v325_v5 = vpop.eup %324  ;;  %v295_v6 = vmul.f32 -1.442695, %v220_v4 }
 0x143   :  { %v228_v7 = vadd.f32 1.0, %v325_v5 }
 0x144   :  { %326 = vpow2.f32 %v295_v6 }
 0x145   :  { %328 = vrcp.f32 %v228_v7  ;;  %v241_v13 = vand.u32 2147483648, %v228_v7  ;;  %v239_v15 = vand.u32 2147483647, %v228_v7  ;;  %vm235_vm1 = vweird.f32 %v228_v7 }
 0x147   :  { %v242_v19 = vor.u32 1.1754944e-38, %v241_v13  ;;  %vm240_vm3 = vcmp.eq.f32.partialorder %v239_v15, 8.507059e+37 }
 0x14a   :  { %v327_v8 = vpop.eup %326 }
 0x14b   :  { %v329_v9 = vpop.eup %328  ;;  %v229_v10 = vadd.f32 1.0, %v327_v8 }
 0x14c   :  { %v231_v11 = vmul.f32 %v329_v9, %v228_v7  ;;  %vm236_vm0 = vweird.f32 %v329_v9 }
 0x14d   :  { %330 = vrcp.f32 %v229_v10  ;;  %vm237_vm2 = vmor %vm235_vm1, %vm236_vm0  ;;  %v256_v26 = vand.u32 2147483648, %v229_v10  ;;  %v254_v28 = vand.u32 2147483647, %v229_v10  ;;  %vm250_vm5 = vweird.f32 %v229_v10 }
 0x14e   :  { %v232_v12 = vsub.f32 1.0, %v231_v11 }
 0x14f   :  { %v257_v31 = vor.u32 1.1754944e-38, %v256_v26  ;;  %vm255_vm7 = vcmp.eq.f32.partialorder %v254_v28, 8.507059e+37 }
 0x150   :  { %v233_v14 = vmul.f32 %v329_v9, %v232_v12 }
 0x152   :  { %v234_v16 = vadd.f32 %v329_v9, %v233_v14 }
 0x153   :  { %v331_v18 = vpop.eup %330 }
 0x154   :  { %v246_v20 = vmul.f32 %v331_v18, %v229_v10  ;;  %v238_v21 = vsel %vm237_vm2, %v329_v9, %v234_v16  ;;  %vm251_vm4 = vweird.f32 %v331_v18 }
 0x155   :  { %v243_v23 = vsel %vm240_vm3, %v242_v19, %v238_v21  ;;  %vm252_vm6 = vmor %vm250_vm5, %vm251_vm4 }
 0x156   :  { %v247_v24 = vsub.f32 1.0, %v246_v20  ;;  %v265_v25 = vmul.f32 %v322_v17, %v243_v23 }
 0x158   :  { %v248_v27 = vmul.f32 %v331_v18, %v247_v24  ;;  %v270_v29 = vadd.f32 %v323_v22, %v265_v25 }
 0x15a   :  { %v249_v30 = vadd.f32 %v331_v18, %v248_v27  ;;  %272 = vst [vmem:[#allocation9] sm:$0xff] %v270_v29 }
 0x15c   :  { %v253_v32 = vsel %vm252_vm6, %v331_v18, %v249_v30 }
 0x15d   :  { %v258_v33 = vsel %vm255_vm7, %v257_v31, %v253_v32 }
 0x15e   :  { %v266_v34 = vmul.f32 %v322_v17, %v258_v33 }
 0x160   :  { %v271_v35 = vadd.f32 %v323_v22, %v266_v34 }
 0x162   :  { %273 = vst [vmem:[#allocation9 + $0x8] sm:$0xff] %v271_v35 }
 0x163   :  { %286 = dma.vmem_to_hbm [thread:$0]  %s279_s23, 256, %s281_s25, [#allocation5], %s435_s9, %s435_s9, %s436_s10  }
 0x164   :  { %432 = dma.done.wait [#allocation5], 256  }
 0x165   :  { %433 = vsyncadd [#allocation5], 4294967040 }
 0x166   :  { %291 = vsyncpa [#allocation4], 1 }
 0x167   :  { %292 = vsyncpa [#allocation7], 1 }
 0x168   :  { %293 = vsyncpa [#allocation5], 1 }

</bundles_post_ra>
